<compile_context>
chip_gen: v7x
topology: tpu7x:2x2x1
jax: 0.10.0
libtpu: 0.0.40
codegen_flags: <defaults>
</compile_context>

<pallas_src>
import jax
import jax.numpy as jnp
from jax.experimental import pallas as pl
from jax.experimental.pallas import tpu as pltpu


def _focal_mse_partial_kernel(pred_ref, gt_ref, w2_ref, out_ref):
    # pred_ref / gt_ref : (TR, HW) in native dtype
    # w2_ref            : (TR, 1) f32  == weight^2 * (0.5 / (B*J*HW))
    # out_ref           : (1, PR, HW) f32 partial sums for this tile
    p = pred_ref[...].astype(jnp.float32)
    g = gt_ref[...].astype(jnp.float32)
    d = p - g
    dd = d * d * w2_ref[...]                      # (TR, HW), pure VPU
    tr, hw = dd.shape
    if tr % 8 == 0:
        # Sublane-group reduce: (TR, HW) -> (TR//8, 8, HW) is a layout-preserving
        # view (split on a sublane-tile boundary); summing the leading axis is
        # elementwise VPU adds of (8, HW) slabs -> lane-dense (8, HW) partial.
        part = jnp.sum(dd.reshape(tr // 8, 8, hw), axis=0)
    else:
        # Fallback for row counts not divisible by 8.
        part = jnp.sum(dd, axis=0, keepdims=True)
    out_ref[0] = part


def _pick_tile_rows(rows, hw, itemsize, target_bytes=4 * 1024 * 1024):
    """Largest multiple-of-8 divisor of `rows` with tile <= ~4 MiB (v7x-safe)."""
    bytes_per_row = max(1, hw * itemsize)
    max_tr = max(1, target_bytes // bytes_per_row)
    best8 = None
    for t in range(8, min(rows, max_tr) + 1, 8):
        if rows % t == 0:
            best8 = t
    if best8 is not None:
        return best8
    # Block shape equal to the full dim is always legal.
    return rows


def focal_loss(output, target, target_weight, use_target_weight=True):
    """output/target: (B, J, H, W); target_weight: (B, J, 1). Returns scalar f32."""
    B, J, H, W = output.shape
    HW = H * W
    rows = B * J

    # Free row-major reshapes -- no extra HBM pass, no dtype cast.
    pred = output.reshape(rows, HW)
    gt = target.reshape(rows, HW)

    scale = 0.5 / float(rows * HW)
    if use_target_weight:
        w = target_weight.astype(jnp.float32).reshape(rows, 1)
        w2 = (w * w) * scale
    else:
        w2 = jnp.full((rows, 1), scale, dtype=jnp.float32)

    itemsize = jnp.dtype(output.dtype).itemsize
    TR = _pick_tile_rows(rows, HW, itemsize)
    num_tiles = rows // TR
    PR = 8 if TR % 8 == 0 else 1

    partials = pl.pallas_call(
        _focal_mse_partial_kernel,
        out_shape=jax.ShapeDtypeStruct((num_tiles, PR, HW), jnp.float32),
        grid=(num_tiles,),
        in_specs=[
            pl.BlockSpec((TR, HW), lambda i: (i, 0)),
            pl.BlockSpec((TR, HW), lambda i: (i, 0)),
            pl.BlockSpec((TR, 1), lambda i: (i, 0)),
        ],
        out_specs=pl.BlockSpec((1, PR, HW), lambda i: (i, 0, 0)),
        compiler_params=pltpu.CompilerParams(
            dimension_semantics=("parallel",)),
    )(pred, gt, w2)

    # Tiny final reduction over (num_tiles, PR, HW) partial sums.
    return jnp.sum(partials)


def _reference_loss(output, target, target_weight, use_target_weight=True):
    B, J, H, W = output.shape
    pred = output.reshape(B, J, H * W).astype(jnp.float32)
    gt = target.reshape(B, J, H * W).astype(jnp.float32)
    w = target_weight.reshape(B, J, 1).astype(jnp.float32)
    if not use_target_weight:
        w = jnp.ones_like(w)
    per_joint = 0.5 * jnp.mean(((pred - gt) * w) ** 2, axis=(0, 2))  # (J,)
    return jnp.sum(per_joint) / J


if __name__ == "__main__":
    B, J, H, W = 2, 4, 16, 16
    key = jax.random.PRNGKey(0)
    k1, k2, k3 = jax.random.split(key, 3)
    output = jax.random.normal(k1, (B, J, H, W), dtype=jnp.float32)
    target = jax.random.normal(k2, (B, J, H, W), dtype=jnp.float32)
    target_weight = jax.random.uniform(k3, (B, J, 1), dtype=jnp.float32)

    # use_target_weight=True (the module's __init__ knob)
    loss = focal_loss(output, target, target_weight, use_target_weight=True)
    loss = jax.block_until_ready(loss)
    ref = _reference_loss(output, target, target_weight, use_target_weight=True)
    assert jnp.allclose(loss, ref, rtol=1e-5, atol=1e-6), (loss, ref)

    # also verify the use_target_weight=False branch
    loss_nw = focal_loss(output, target, target_weight, use_target_weight=False)
    loss_nw = jax.block_until_ready(loss_nw)
    ref_nw = _reference_loss(output, target, target_weight, use_target_weight=False)
    assert jnp.allclose(loss_nw, ref_nw, rtol=1e-5, atol=1e-6), (loss_nw, ref_nw)

    print("KERNEL_OK")
</pallas_src>

<mosaic_0001>
module attributes {stable_mosaic.version = 11 : i64} {
  func.func @_focal_mse_partial_kernel(%arg0: i32, %arg1: memref<8x256xf32, #tpu.memory_space<vmem>>, %arg2: memref<8x256xf32, #tpu.memory_space<vmem>>, %arg3: memref<8x1xf32, #tpu.memory_space<vmem>>, %arg4: memref<1x8x256xf32, #tpu.memory_space<vmem>>) attributes {dimension_semantics = [#tpu.dimension_semantics<parallel>], iteration_bounds = array<i64: 1>, scalar_prefetch = 0 : i64, scratch_operands = 0 : i64, tpu.core_type = #tpu.core_type<tc>, window_params = [{transform_indices = @transform_0, window_bounds = array<i64: 8, 256>}, {transform_indices = @transform_1, window_bounds = array<i64: 8, 256>}, {transform_indices = @transform_2, window_bounds = array<i64: 8, 1>}, {transform_indices = @transform_3, window_bounds = array<i64: 1, 8, 256>}]} {
    %c0 = arith.constant 0 : index
    %c0_0 = arith.constant 0 : index
    %0 = vector.load %arg1[%c0, %c0_0] : memref<8x256xf32, #tpu.memory_space<vmem>>, vector<8x256xf32>
    %c0_1 = arith.constant 0 : index
    %c0_2 = arith.constant 0 : index
    %1 = vector.load %arg2[%c0_1, %c0_2] : memref<8x256xf32, #tpu.memory_space<vmem>>, vector<8x256xf32>
    %2 = arith.subf %0, %1 : vector<8x256xf32>
    %3 = arith.mulf %2, %2 : vector<8x256xf32>
    %c0_3 = arith.constant 0 : index
    %c0_4 = arith.constant 0 : index
    %4 = vector.load %arg3[%c0_3, %c0_4] : memref<8x1xf32, #tpu.memory_space<vmem>>, vector<8x1xf32>
    %5 = vector.broadcast %4 : vector<8x1xf32> to vector<8x256xf32>
    %6 = arith.mulf %3, %5 : vector<8x256xf32>
    %7 = vector.shape_cast %6 : vector<8x256xf32> to vector<1x8x256xf32>
    %cst = arith.constant dense<0.000000e+00> : vector<8x256xf32>
    %8 = vector.multi_reduction <add>, %7, %cst [0] : vector<1x8x256xf32> to vector<8x256xf32>
    %c0_5 = arith.constant 0 : index
    %c0_6 = arith.constant 0 : index
    %c0_7 = arith.constant 0 : index
    %9 = vector.load %arg4[%c0_5, %c0_6, %c0_7] : memref<1x8x256xf32, #tpu.memory_space<vmem>>, vector<1x8x256xf32>
    %10 = vector.shape_cast %9 : vector<1x8x256xf32> to vector<8x256xf32>
    %11 = vector.shape_cast %8 : vector<8x256xf32> to vector<1x8x256xf32>
    tpu.vector_store %arg4[%c0_5, %c0_6, %c0_7], %11 {strides = array<i32>} : memref<1x8x256xf32, #tpu.memory_space<vmem>>, vector<1x8x256xf32>,
    return
  }
  func.func @transform_0(%arg0: i32) -> (i32, i32) {
    %c0_i32 = arith.constant 0 : i32
    %c0_i32_0 = arith.constant 0 : i32
    return %arg0, %c0_i32 : i32, i32
  }
  func.func @transform_1(%arg0: i32) -> (i32, i32) {
    %c0_i32 = arith.constant 0 : i32
    %c0_i32_0 = arith.constant 0 : i32
    return %arg0, %c0_i32 : i32, i32
  }
  func.func @transform_2(%arg0: i32) -> (i32, i32) {
    %c0_i32 = arith.constant 0 : i32
    %c0_i32_0 = arith.constant 0 : i32
    return %arg0, %c0_i32 : i32, i32
  }
  func.func @transform_3(%arg0: i32) -> (i32, i32, i32) {
    %c0_i32 = arith.constant 0 : i32
    %c0_i32_0 = arith.constant 0 : i32
    %c0_i32_1 = arith.constant 0 : i32
    return %arg0, %c0_i32, %c0_i32_0 : i32, i32, i32
  }
}

</mosaic_0001>

<bundles_post_ra>
// kernel: tpu_custom_call.1
= control target key start
LH: loop header
LB: loop body
LE: loop exit
PB: predicated region body
PF: predicated region fallthrough
CT: control target
= control target key end

     0   :  { %8 = vsyncpa [#allocation3], 0  ;;  %s215_s0 = inlined_call_operand.hbm [shape: f32[8,256], index: 0, kind: input, shape index: {}]   ;;  %s216_s1 = inlined_call_operand.hbm [shape: f32[8,256], index: 1, kind: input, shape index: {}]   ;;  %s217_s2 = inlined_call_operand.vmem [shape: f32[8,1], index: 2, kind: input, shape index: {}]   ;;  %s218_s3 = inlined_call_operand.hbm [shape: f32[1,8,256], index: 3, kind: output, shape index: {}]  }
   0x1   :  { %9 = vsyncpa [#allocation6], 0 }
   0x2   :  { %10 = vsyncpa [#allocation4], 0  ;;  %s152_s12 = smov [#allocation2]   ;;  %s153_s14 = smov [#allocation5]  }
   0x3   :  { %s17_s13 = sshll.u32 %s152_s12, 4  ;;  %s27_s15 = sshll.u32 %s153_s14, 4  ;;  %s18_s13 = int_to_ptr.vmem [resolvable:$true] %s17_s13  ;;  %s28_s15 = int_to_ptr.vmem [resolvable:$true] %s27_s15 }
   0x4   :  { %s80_s18 = scalar_lea.hbm %s215_s0, 256 }
   0x5   :  { %p81_p0 = scmp.ne.s32.totalorder %s215_s0, %s80_s18  ;;  %p84_p1 = scmp.lt.u32.totalorder %s80_s18, %s215_s0 }
   0x7   :  { %p86_p2 = pnand %p84_p1, %p81_p0 }
   0x9   :  { %89 = shalt.err (!%p86_p2)
}
   0xa   :  { %s90_s23 = scalar_lea.vmem %s18_s13, 256  ;;  %p95_p4 = scmp.lt.s32.totalorder %s18_s13, %s18_s13 }
   0xb   :  { %p91_p3 = scmp.ne.s32.totalorder %s18_s13, %s90_s23  ;;  %p96_p5 = scmp.lt.s32.totalorder %s90_s23, %s90_s23 }
   0xd   :  { %p97_p6 = por %p96_p5, %p95_p4 }
   0xf   :  { %p98_p7 = pnand %p97_p6, %p91_p3 }
  0x11   :  { %101 = shalt.err (!%p98_p7)
}
  0x12   :  { %20 = dma.hbm_to_vmem [thread:$0]  %s215_s0, 256, %s18_s13, [#allocation3]  }
  0x13   :  { %s102_s28 = scalar_lea.hbm %s216_s1, 256 }
  0x14   :  { %p103_p8 = scmp.ne.s32.totalorder %s216_s1, %s102_s28  ;;  %p106_p9 = scmp.lt.u32.totalorder %s102_s28, %s216_s1 }
  0x16   :  { %p108_p10 = pnand %p106_p9, %p103_p8 }
  0x18   :  { %111 = shalt.err (!%p108_p10)
}
  0x19   :  { %s112_s6 = scalar_lea.vmem %s28_s15, 256  ;;  %p117_p12 = scmp.lt.s32.totalorder %s28_s15, %s28_s15 }
  0x1a   :  { %p113_p11 = scmp.ne.s32.totalorder %s28_s15, %s112_s6  ;;  %p118_p13 = scmp.lt.s32.totalorder %s112_s6, %s112_s6 }
  0x1c   :  { %p119_p0 = por %p118_p13, %p117_p12 }
  0x1e   :  { %p120_p1 = pnand %p119_p0, %p113_p11 }
  0x20   :  { %123 = shalt.err (!%p120_p1)
}
  0x21   :  { %30 = dma.hbm_to_vmem [thread:$0]  %s216_s1, 256, %s28_s15, [#allocation6]  }
  0x22   :  { %146 = dma.done.wait [#allocation3], 256  }
  0x23   :  { %147 = vsyncadd [#allocation3], 4294967040 }
  0x24   :  { %148 = dma.done.wait [#allocation6], 256  }
  0x25   :  { %149 = vsyncadd [#allocation6], 4294967040  ;;  %v154_v0 = vmov 0   ;;  %v47_v1 = vld [vmem:[%s217_s2] sm:$0xff]  ;;  %v40_v3 = vld [vmem:[#allocation2 + $0x8] sm:$0xff]  ;;  %s155_s1 = smov [#allocation7]  }
  0x26   :  { %79 = vset.pattern.permute.xlu0 %v154_v0  ;;  %v39_v2 = vld [vmem:[#allocation2] sm:$0xff]  ;;  %v41_v4 = vld [vmem:[#allocation5] sm:$0xff]  ;;  %v42_v5 = vld [vmem:[#allocation5 + $0x8] sm:$0xff]  ;;  %s65_s10 = sshll.u32 %s155_s1, 4  ;;  %s66_s10 = int_to_ptr.vmem [resolvable:$true] %s65_s10 }
  0x27   :  { %50 = vperm.xlu0 %79, %v47_v1   ;;  %v43_v6 = vsub.f32 %v39_v2, %v41_v4  ;;  %v44_v7 = vsub.f32 %v40_v3, %v42_v5  ;;  %s124_s11 = scalar_lea.vmem %s66_s10, 256  ;;  %p129_p3 = scmp.lt.s32.totalorder %s66_s10, %s66_s10 }
  0x28   :  { %p125_p2 = scmp.ne.s32.totalorder %s66_s10, %s124_s11  ;;  %p130_p4 = scmp.lt.s32.totalorder %s124_s11, %s124_s11 }
  0x29   :  { %v45_v8 = vmul.f32 %v43_v6, %v43_v6  ;;  %v46_v9 = vmul.f32 %v44_v7, %v44_v7 }
  0x2a   :  { %p131_p5 = por %p130_p4, %p129_p3 }
  0x2c   :  { %p132_p6 = pnand %p131_p5, %p125_p2 }
  0xa6   :  { %v51_v10 = vpop.permute.xlu0 %50 }
  0xa7   :  { %v53_v11 = vmul.f32 %v51_v10, %v45_v8  ;;  %v54_v12 = vmul.f32 %v51_v10, %v46_v9 }
  0xa9   :  { %57 = vst [vmem:[#allocation7] sm:$0xff] %v53_v11  ;;  %58 = vst [vmem:[#allocation7 + $0x8] sm:$0xff] %v54_v12 }
  0xaa   :  { %135 = shalt.err (!%p132_p6)
}
  0xab   :  { %s136_s13 = scalar_lea.hbm %s218_s3, 256 }
  0xac   :  { %p137_p7 = scmp.ne.s32.totalorder %s218_s3, %s136_s13  ;;  %p140_p8 = scmp.lt.u32.totalorder %s136_s13, %s218_s3 }
  0xae   :  { %p142_p9 = pnand %p140_p8, %p137_p7 }
  0xb0   :  { %145 = shalt.err (!%p142_p9)
}
  0xb1   :  { %68 = dma.vmem_to_hbm [thread:$0]  %s66_s10, 256, %s218_s3, [#allocation4]  }
  0xb2   :  { %150 = dma.done.wait [#allocation4], 256  }
  0xb3   :  { %151 = vsyncadd [#allocation4], 4294967040 }
  0xb4   :  { %72 = vsyncpa [#allocation3], 1 }
  0xb5   :  { %73 = vsyncpa [#allocation6], 1 }
  0xb6   :  { %74 = vsyncpa [#allocation4], 1 }

</bundles_post_ra>
